<compile_context>
chip_gen: v7x
topology: tpu7x:2x2x1
jax: 0.10.0
libtpu: 0.0.40
codegen_flags: <defaults>
</compile_context>

<pallas_src>
import functools

import jax
import jax.numpy as jnp
from jax import lax
from jax.experimental import pallas as pl
from jax.experimental.pallas import tpu as pltpu

_NEG_BIG = -1e30  # finite "-inf" so exp() underflows to 0 without NaN risk


def _round_up(x, m):
    return ((x + m - 1) // m) * m


def _cdiv(a, b):
    return -(-a // b)


def _attention_mil_kernel(
    x_ref, w1t_ref, b1_ref, w2_ref, b2_ref,            # inputs
    a_ref, m_out_ref, l_out_ref, z_out_ref,            # outputs
    m_sc, l_sc, z_acc,                                  # scratch (f32)
    *, n_valid, tile_n, tiles_per_split,
):
    c = pl.program_id(0)   # split index (megacore-parallel on v7x)
    j = pl.program_id(1)   # instance-tile index inside the split (reduction axis)

    @pl.when(j == 0)
    def _init():
        m_sc[...] = jnp.full_like(m_sc, _NEG_BIG)
        l_sc[...] = jnp.zeros_like(l_sc)
        z_acc[...] = jnp.zeros_like(z_acc)

    # ---- attention MLP on this tile of instances (MXU, x's native dtype) ----
    x_t = x_ref[...]                                                   # (TN, M)
    h = jnp.tanh(
        jnp.dot(x_t, w1t_ref[...], preferred_element_type=jnp.float32)
        + b1_ref[...])                                                 # (TN, Lp) f32
    # second Linear (L -> 1), produced lane-major as a (1, TN) row: w2 . h^T on MXU
    a_row = lax.dot_general(
        w2_ref[...], h, (((1,), (1,)), ((), ())),
        preferred_element_type=jnp.float32) + b2_ref[...]              # (1, TN)

    # mask padded instances of partial / fully-padded tiles
    tile_idx = c * tiles_per_split + j
    col = tile_idx * tile_n + lax.broadcasted_iota(jnp.int32, (1, tile_n), 1)
    a_row = jnp.where(col < n_valid, a_row, _NEG_BIG)

    # stream raw logits out (full lane-major block per tile, not VMEM-resident)
    a_ref[...] = a_row[None]                                           # (1, 1, TN)

    # ---- online-softmax accumulation of z = sum_i softmax(a)_i * x_i --------
    m_prev = m_sc[...]                                                 # (1, 1)
    m_new = jnp.maximum(m_prev, jnp.max(a_row, axis=-1, keepdims=True))
    corr = jnp.exp(m_prev - m_new)                                     # (1, 1)
    p = jnp.exp(a_row - m_new)                                         # (1, TN) f32
    l_sc[...] = corr * l_sc[...] + jnp.sum(p, axis=-1, keepdims=True)
    # (1, TN) @ (TN, M) on the MXU: no (TN, M) f32 temporary, hides under the x DMA
    z_acc[...] = corr * z_acc[...] + lax.dot_general(
        p.astype(x_t.dtype), x_t, (((1,), (0,)), ((), ())),
        preferred_element_type=jnp.float32)
    m_sc[...] = m_new

    # ---- per-split partials written once, on the last tile of this split ----
    @pl.when(j == pl.num_programs(1) - 1)
    def _finalize():
        m_out_ref[...] = m_sc[...][None]
        l_out_ref[...] = l_sc[...][None]
        z_out_ref[...] = z_acc[...][None]


def attention_mil_forward(x, w1, b1, w2, b2, wc, bc, *,
                          tile_n=None, num_splits=None, x_buffers=2):
    """MIL attention forward.

    x : (1, N, M) or (N, M) bag of instances (f32 or bf16)
    w1: (L, M), b1: (L,)      first attention Linear
    w2: (1, L), b2: (1,)      second attention Linear (ATTENTION_BRANCHES == 1)
    wc: (1, M), bc: (1,)      classifier Linear
    Returns (Y_prob (1,1) f32, Y_hat (1,1) f32, A (1, N) f32).
    """
    if x.ndim == 3:
        x = jnp.squeeze(x, axis=0)                 # matches torch x.squeeze(0)
    n, m_dim = x.shape
    if n == 0:
        raise ValueError("empty bag (N == 0) is not supported")
    l_dim = w1.shape[0]
    itemsize = jnp.dtype(x.dtype).itemsize
    align = 8 if itemsize >= 4 else 16             # sublane packing (f32 vs bf16)

    # ---- tile sizing: ~8 MiB x blocks amortize the ~0.35 us per-step cost ----
    if tile_n is None:
        t = (8 << 20) // max(1, m_dim * itemsize)
        t = max(256, min(4096, t))
        t = _round_up(t, 128)                      # lane-dense logits store
        tile_n = min(t, _round_up(n, align))
    tile_n = max(align, _round_up(int(tile_n), align))

    num_tiles = _cdiv(n, tile_n)
    if num_splits is None:
        num_splits = 2 if num_tiles >= 2 else 1    # feed both TCs on v7x; harmless on v5e/v6e
    num_splits = max(1, min(int(num_splits), num_tiles))
    tiles_per_split = _cdiv(num_tiles, num_splits)
    total_tiles = num_splits * tiles_per_split
    total_rows = total_tiles * tile_n
    if total_rows != n:
        x = jnp.pad(x, ((0, total_rows - n), (0, 0)))   # masked in-kernel

    # ---- one-time layout / dtype plumbing (casts hoisted out of the kernel) ---
    l_pad = _round_up(l_dim, 128)                  # zero-pad L for the MXU (exact)
    w1t = jnp.transpose(w1).astype(x.dtype)        # (M, L): matmul dtype follows x
    w1t = jnp.pad(w1t, ((0, 0), (0, l_pad - l_dim)))
    b1r = jnp.pad(b1.astype(jnp.float32).reshape(1, l_dim),
                  ((0, 0), (0, l_pad - l_dim)))
    w2r = jnp.pad(w2.astype(jnp.float32).reshape(1, l_dim),
                  ((0, 0), (0, l_pad - l_dim)))
    b2r = b2.astype(jnp.float32).reshape(1, 1)

    kernel = functools.partial(_attention_mil_kernel, n_valid=n,
                               tile_n=tile_n, tiles_per_split=tiles_per_split)

    # deeper buffering only on the one streamed input, and only if requested
    x_spec_kwargs = {}
    nbuf = max(2, int(x_buffers)) if x_buffers else 2
    if nbuf != 2:
        x_spec_kwargs["pipeline_mode"] = pl.Buffered(nbuf)
    x_spec = pl.BlockSpec((tile_n, m_dim),
                          lambda c, j: (c * tiles_per_split + j, 0),
                          **x_spec_kwargs)

    grid_spec = pltpu.PrefetchScalarGridSpec(
        num_scalar_prefetch=0,
        grid=(num_splits, tiles_per_split),
        in_specs=[
            x_spec,                                                # x: streamed tiles
            pl.BlockSpec((m_dim, l_pad), lambda c, j: (0, 0)),     # W1^T (resident)
            pl.BlockSpec((1, l_pad), lambda c, j: (0, 0)),         # b1
            pl.BlockSpec((1, l_pad), lambda c, j: (0, 0)),         # w2
            pl.BlockSpec((1, 1), lambda c, j: (0, 0)),             # b2
        ],
        out_specs=(
            pl.BlockSpec((1, 1, tile_n),
                         lambda c, j: (c * tiles_per_split + j, 0, 0)),  # raw logits
            pl.BlockSpec((1, 1, 1), lambda c, j: (c, 0, 0)),             # m partial
            pl.BlockSpec((1, 1, 1), lambda c, j: (c, 0, 0)),             # l partial
            pl.BlockSpec((1, 1, m_dim), lambda c, j: (c, 0, 0)),         # z partial
        ),
        scratch_shapes=[
            pltpu.VMEM((1, 1), jnp.float32),       # running max
            pltpu.VMEM((1, 1), jnp.float32),       # running sum-exp
            pltpu.VMEM((1, m_dim), jnp.float32),   # running weighted instance sum
        ],
    )

    # scoped-VMEM limit sized to the chosen tile; 64 MiB cap keeps it inside v7x
    x_blk = tile_n * m_dim * itemsize
    w_blk = m_dim * l_pad * itemsize
    est = nbuf * (x_blk + tile_n * 4) + 2 * w_blk + 4 * m_dim * 4 + (2 << 20)
    vmem_limit = int(min(64 << 20, max(32 << 20, 2 * est)))

    a_tiles, m_parts, l_parts, z_parts = pl.pallas_call(
        kernel,
        out_shape=(
            jax.ShapeDtypeStruct((total_tiles, 1, tile_n), jnp.float32),
            jax.ShapeDtypeStruct((num_splits, 1, 1), jnp.float32),
            jax.ShapeDtypeStruct((num_splits, 1, 1), jnp.float32),
            jax.ShapeDtypeStruct((num_splits, 1, m_dim), jnp.float32),
        ),
        grid_spec=grid_spec,
        compiler_params=pltpu.CompilerParams(
            dimension_semantics=("parallel", "arbitrary"),
            vmem_limit_bytes=vmem_limit,
        ),
    )(x, w1t, b1r, w2r, b2r)

    # ---- tiny cross-split online-softmax combine + classifier head (in JAX) ----
    m_p = m_parts[:, 0, :]                                   # (S, 1)
    l_p = l_parts[:, 0, :]                                   # (S, 1)
    z_p = z_parts[:, 0, :]                                   # (S, M)
    m_g = jnp.max(m_p, axis=0, keepdims=True)                # (1, 1)
    scale = jnp.exp(m_p - m_g)                               # (S, 1)
    l_g = jnp.sum(l_p * scale, axis=0, keepdims=True)        # (1, 1)
    z_g = jnp.sum(z_p * scale, axis=0, keepdims=True)        # (1, M)
    Z = z_g / l_g                                            # (1, M) == softmax(a)^T @ x
    wc32 = wc.astype(jnp.float32).reshape(1, m_dim)
    bc32 = bc.astype(jnp.float32).reshape(1, 1)
    logit = Z @ wc32.T + bc32                                # (1, 1)
    y_prob = jax.nn.sigmoid(logit)
    y_hat = (y_prob >= 0.5).astype(jnp.float32)
    a_raw = a_tiles.reshape(1, total_rows)[:, :n]            # (1, N) raw logits
    A = jnp.exp(a_raw - m_g) / l_g                           # exact softmax
    return y_prob, y_hat, A


if __name__ == "__main__":
    def _ref_forward(x, w1, b1, w2, b2, wc, bc):
        xs = jnp.squeeze(x, 0) if x.ndim == 3 else x
        h = jnp.tanh(xs @ w1.T + b1[None, :])
        a = h @ w2.T + b2[None, :]                 # (N, 1)
        A = jax.nn.softmax(a.T, axis=1)            # (1, N)
        z = A @ xs                                 # (1, M)
        logit = z @ wc.T + bc[None, :]
        y_prob = jax.nn.sigmoid(logit)
        y_hat = (y_prob >= 0.5).astype(jnp.float32)
        return y_prob, y_hat, A

    def _make_inputs(key, n, m, l):
        kx, k1, k2, k3, k4, k5, k6 = jax.random.split(key, 7)
        x = jax.random.normal(kx, (1, n, m), dtype=jnp.float32)   # (1, N, M) like PyTorch
        bm = 1.0 / (m ** 0.5)
        bl = 1.0 / (l ** 0.5)
        w1 = jax.random.uniform(k1, (l, m), minval=-bm, maxval=bm, dtype=jnp.float32)
        b1 = jax.random.uniform(k2, (l,), minval=-bm, maxval=bm, dtype=jnp.float32)
        w2 = jax.random.uniform(k3, (1, l), minval=-bl, maxval=bl, dtype=jnp.float32)
        b2 = jax.random.uniform(k4, (1,), minval=-bl, maxval=bl, dtype=jnp.float32)
        wc = jax.random.uniform(k5, (1, m), minval=-bm, maxval=bm, dtype=jnp.float32)
        bc = jax.random.uniform(k6, (1,), minval=-bm, maxval=bm, dtype=jnp.float32)
        return x, w1, b1, w2, b2, wc, bc

    key_a, key_b = jax.random.split(jax.random.PRNGKey(0))

    # 1) tiny bag with forced small tiles: exercises the 2-way split grid, partial-tile
    #    masking, and a fully padded trailing tile.
    args = _make_inputs(key_a, n=20, m=128, l=64)
    y_prob, y_hat, A = attention_mil_forward(*args, tile_n=8)
    jax.block_until_ready((y_prob, y_hat, A))
    y_prob_r, y_hat_r, A_r = _ref_forward(*args)
    assert jnp.allclose(A, A_r, atol=1e-5), (A, A_r)
    assert jnp.allclose(y_prob, y_prob_r, atol=1e-5), (y_prob, y_prob_r)
    assert jnp.array_equal(y_hat, y_hat_r), (y_hat, y_hat_r)

    # 2) larger bag with the default (large-tile, auto-split) configuration.
    args = _make_inputs(key_b, n=5000, m=128, l=64)
    y_prob, y_hat, A = attention_mil_forward(*args)
    jax.block_until_ready((y_prob, y_hat, A))
    y_prob_r, y_hat_r, A_r = _ref_forward(*args)
    assert jnp.allclose(A, A_r, atol=1e-5), (A, A_r)
    assert jnp.allclose(y_prob, y_prob_r, atol=1e-5), (y_prob, y_prob_r)
    assert jnp.array_equal(y_hat, y_hat_r), (y_hat, y_hat_r)

    print("KERNEL_OK")
</pallas_src>

<mosaic_0001>
module attributes {stable_mosaic.version = 11 : i64} {
  func.func @_attention_mil_kernel(%arg0: i32, %arg1: i32, %arg2: memref<8x128xf32, #tpu.memory_space<vmem>>, %arg3: memref<128x128xf32, #tpu.memory_space<vmem>>, %arg4: memref<1x128xf32, #tpu.memory_space<vmem>>, %arg5: memref<1x128xf32, #tpu.memory_space<vmem>>, %arg6: memref<1x1xf32, #tpu.memory_space<vmem>>, %arg7: memref<1x1x8xf32, #tpu.memory_space<vmem>>, %arg8: memref<1x1x1xf32, #tpu.memory_space<vmem>>, %arg9: memref<1x1x1xf32, #tpu.memory_space<vmem>>, %arg10: memref<1x1x128xf32, #tpu.memory_space<vmem>>, %arg11: memref<1x1xf32, #tpu.memory_space<vmem>>, %arg12: memref<1x1xf32, #tpu.memory_space<vmem>>, %arg13: memref<1x128xf32, #tpu.memory_space<vmem>>) attributes {dimension_semantics = [#tpu.dimension_semantics<parallel>, #tpu.dimension_semantics<arbitrary>], iteration_bounds = array<i64: 2, 2>, scalar_prefetch = 0 : i64, scratch_operands = 3 : i64, tpu.core_type = #tpu.core_type<tc>, window_params = [{transform_indices = @transform_0, window_bounds = array<i64: 8, 128>}, {pipeline_mode = #tpu.pipeline_mode<synchronous>, transform_indices = @transform_1, window_bounds = array<i64: 128, 128>}, {pipeline_mode = #tpu.pipeline_mode<synchronous>, transform_indices = @transform_2, window_bounds = array<i64: 1, 128>}, {pipeline_mode = #tpu.pipeline_mode<synchronous>, transform_indices = @transform_3, window_bounds = array<i64: 1, 128>}, {pipeline_mode = #tpu.pipeline_mode<synchronous>, transform_indices = @transform_4, window_bounds = array<i64: 1, 1>}, {transform_indices = @transform_5, window_bounds = array<i64: 1, 1, 8>}, {transform_indices = @transform_6, window_bounds = array<i64: 1, 1, 1>}, {transform_indices = @transform_7, window_bounds = array<i64: 1, 1, 1>}, {transform_indices = @transform_8, window_bounds = array<i64: 1, 1, 128>}]} {
    %c0_i32 = arith.constant 0 : i32
    %0 = arith.cmpi eq, %arg1, %c0_i32 : i32
    %1 = arith.extui %0 : i1 to i32
    %c0_i32_0 = arith.constant 0 : i32
    %2 = arith.cmpi ne, %1, %c0_i32_0 : i32
    scf.if %2 {
      %cst_31 = arith.constant -1.000000e+30 : f32
      %52 = vector.broadcast %cst_31 : f32 to vector<1x1xf32>
      %c0_32 = arith.constant 0 : index
      %c0_33 = arith.constant 0 : index
      %53 = vector.load %arg11[%c0_32, %c0_33] : memref<1x1xf32, #tpu.memory_space<vmem>>, vector<1x1xf32>
      tpu.vector_store %arg11[%c0_32, %c0_33], %52 {strides = array<i32>} : memref<1x1xf32, #tpu.memory_space<vmem>>, vector<1x1xf32>,
      %cst_34 = arith.constant 0.000000e+00 : f32
      %54 = vector.broadcast %cst_34 : f32 to vector<1x1xf32>
      %c0_35 = arith.constant 0 : index
      %c0_36 = arith.constant 0 : index
      %55 = vector.load %arg12[%c0_35, %c0_36] : memref<1x1xf32, #tpu.memory_space<vmem>>, vector<1x1xf32>
      tpu.vector_store %arg12[%c0_35, %c0_36], %54 {strides = array<i32>} : memref<1x1xf32, #tpu.memory_space<vmem>>, vector<1x1xf32>,
      %cst_37 = arith.constant 0.000000e+00 : f32
      %56 = vector.broadcast %cst_37 : f32 to vector<1x128xf32>
      %c0_38 = arith.constant 0 : index
      %c0_39 = arith.constant 0 : index
      %57 = vector.load %arg13[%c0_38, %c0_39] : memref<1x128xf32, #tpu.memory_space<vmem>>, vector<1x128xf32>
      tpu.vector_store %arg13[%c0_38, %c0_39], %56 {strides = array<i32>} : memref<1x128xf32, #tpu.memory_space<vmem>>, vector<1x128xf32>,
    } else {
    }
    %c0 = arith.constant 0 : index
    %c0_1 = arith.constant 0 : index
    %3 = vector.load %arg2[%c0, %c0_1] : memref<8x128xf32, #tpu.memory_space<vmem>>, vector<8x128xf32>
    %c0_2 = arith.constant 0 : index
    %c0_3 = arith.constant 0 : index
    %4 = vector.load %arg3[%c0_2, %c0_3] : memref<128x128xf32, #tpu.memory_space<vmem>>, vector<128x128xf32>
    %cst = arith.constant dense<0.000000e+00> : vector<8x128xf32>
    %5 = tpu.matmul %3, %4, %cst {dimension_numbers = #tpu.dot_dimension_numbers<[1], [0], [0], [1], [0, 0, 1, 1], [], []>} : vector<8x128xf32>, vector<128x128xf32>, vector<8x128xf32> -> vector<8x128xf32>
    %c0_4 = arith.constant 0 : index
    %c0_5 = arith.constant 0 : index
    %6 = vector.load %arg4[%c0_4, %c0_5] : memref<1x128xf32, #tpu.memory_space<vmem>>, vector<1x128xf32>
    %7 = vector.broadcast %6 : vector<1x128xf32> to vector<8x128xf32>
    %8 = arith.addf %5, %7 : vector<8x128xf32>
    %9 = math.tanh %8 : vector<8x128xf32>
    %c0_6 = arith.constant 0 : index
    %c0_7 = arith.constant 0 : index
    %10 = vector.load %arg5[%c0_6, %c0_7] : memref<1x128xf32, #tpu.memory_space<vmem>>, vector<1x128xf32>
    %cst_8 = arith.constant dense<0.000000e+00> : vector<1x8xf32>
    %11 = tpu.matmul %10, %9, %cst_8 {dimension_numbers = #tpu.dot_dimension_numbers<[1], [1], [0], [0], [0, 0, 1, 0], [], []>} : vector<1x128xf32>, vector<8x128xf32>, vector<1x8xf32> -> vector<1x8xf32>
    %c0_9 = arith.constant 0 : index
    %c0_10 = arith.constant 0 : index
    %12 = vector.load %arg6[%c0_9, %c0_10] : memref<1x1xf32, #tpu.memory_space<vmem>>, vector<1x1xf32>
    %13 = vector.broadcast %12 : vector<1x1xf32> to vector<1x8xf32>
    %14 = arith.addf %11, %13 : vector<1x8xf32>
    %c2_i32 = arith.constant 2 : i32
    %15 = arith.muli %arg0, %c2_i32 : i32
    %16 = arith.addi %15, %arg1 : i32
    %c8_i32 = arith.constant 8 : i32
    %17 = arith.muli %16, %c8_i32 : i32
    %18 = tpu.iota {dimensions = array<i32: 1>} : vector<1x8xi32>
    %19 = vector.broadcast %17 : i32 to vector<1x8xi32>
    %20 = arith.addi %19, %18 : vector<1x8xi32>
    %c20_i32 = arith.constant 20 : i32
    %21 = vector.broadcast %c20_i32 : i32 to vector<1x8xi32>
    %22 = arith.cmpi slt, %20, %21 : vector<1x8xi32>
    %cst_11 = arith.constant -1.000000e+30 : f32
    %23 = vector.broadcast %cst_11 : f32 to vector<1x8xf32>
    %24 = arith.select %22, %14, %23 : vector<1x8xi1>, vector<1x8xf32>
    %25 = vector.shape_cast %24 : vector<1x8xf32> to vector<1x1x8xf32>
    %c0_12 = arith.constant 0 : index
    %c0_13 = arith.constant 0 : index
    %c0_14 = arith.constant 0 : index
    %26 = vector.load %arg7[%c0_12, %c0_13, %c0_14] : memref<1x1x8xf32, #tpu.memory_space<vmem>>, vector<1x1x8xf32>
    tpu.vector_store %arg7[%c0_12, %c0_13, %c0_14], %25 {strides = array<i32>} : memref<1x1x8xf32, #tpu.memory_space<vmem>>, vector<1x1x8xf32>,
    %c0_15 = arith.constant 0 : index
    %c0_16 = arith.constant 0 : index
    %27 = vector.load %arg11[%c0_15, %c0_16] : memref<1x1xf32, #tpu.memory_space<vmem>>, vector<1x1xf32>
    %cst_17 = arith.constant dense<0xFF800000> : vector<1xf32>
    %28 = vector.multi_reduction <maximumf>, %24, %cst_17 [1] : vector<1x8xf32> to vector<1xf32>
    %29 = vector.shape_cast %28 : vector<1xf32> to vector<1x1xf32>
    %30 = arith.maximumf %27, %29 : vector<1x1xf32>
    %31 = arith.subf %27, %30 : vector<1x1xf32>
    %32 = math.exp %31 : vector<1x1xf32>
    %33 = vector.broadcast %30 : vector<1x1xf32> to vector<1x8xf32>
    %34 = arith.subf %24, %33 : vector<1x8xf32>
    %35 = math.exp %34 : vector<1x8xf32>
    %c0_18 = arith.constant 0 : index
    %c0_19 = arith.constant 0 : index
    %36 = vector.load %arg12[%c0_18, %c0_19] : memref<1x1xf32, #tpu.memory_space<vmem>>, vector<1x1xf32>
    %37 = arith.mulf %32, %36 : vector<1x1xf32>
    %cst_20 = arith.constant dense<0.000000e+00> : vector<1xf32>
    %38 = vector.multi_reduction <add>, %35, %cst_20 [1] : vector<1x8xf32> to vector<1xf32>
    %39 = vector.shape_cast %38 : vector<1xf32> to vector<1x1xf32>
    %40 = arith.addf %37, %39 : vector<1x1xf32>
    %c0_21 = arith.constant 0 : index
    %c0_22 = arith.constant 0 : index
    %41 = vector.load %arg12[%c0_21, %c0_22] : memref<1x1xf32, #tpu.memory_space<vmem>>, vector<1x1xf32>
    tpu.vector_store %arg12[%c0_21, %c0_22], %40 {strides = array<i32>} : memref<1x1xf32, #tpu.memory_space<vmem>>, vector<1x1xf32>,
    %c0_23 = arith.constant 0 : index
    %c0_24 = arith.constant 0 : index
    %42 = vector.load %arg13[%c0_23, %c0_24] : memref<1x128xf32, #tpu.memory_space<vmem>>, vector<1x128xf32>
    %43 = vector.broadcast %32 : vector<1x1xf32> to vector<1x128xf32>
    %44 = arith.mulf %43, %42 : vector<1x128xf32>
    %cst_25 = arith.constant dense<0.000000e+00> : vector<1x128xf32>
    %45 = tpu.matmul %35, %3, %cst_25 {dimension_numbers = #tpu.dot_dimension_numbers<[1], [0], [0], [1], [0, 0, 1, 1], [], []>} : vector<1x8xf32>, vector<8x128xf32>, vector<1x128xf32> -> vector<1x128xf32>
    %46 = arith.addf %44, %45 : vector<1x128xf32>
    %c0_26 = arith.constant 0 : index
    %c0_27 = arith.constant 0 : index
    %47 = vector.load %arg13[%c0_26, %c0_27] : memref<1x128xf32, #tpu.memory_space<vmem>>, vector<1x128xf32>
    tpu.vector_store %arg13[%c0_26, %c0_27], %46 {strides = array<i32>} : memref<1x128xf32, #tpu.memory_space<vmem>>, vector<1x128xf32>,
    %c0_28 = arith.constant 0 : index
    %c0_29 = arith.constant 0 : index
    %48 = vector.load %arg11[%c0_28, %c0_29] : memref<1x1xf32, #tpu.memory_space<vmem>>, vector<1x1xf32>
    tpu.vector_store %arg11[%c0_28, %c0_29], %30 {strides = array<i32>} : memref<1x1xf32, #tpu.memory_space<vmem>>, vector<1x1xf32>,
    %c1_i32 = arith.constant 1 : i32
    %49 = arith.cmpi eq, %arg1, %c1_i32 : i32
    %50 = arith.extui %49 : i1 to i32
    %c0_i32_30 = arith.constant 0 : i32
    %51 = arith.cmpi ne, %50, %c0_i32_30 : i32
    scf.if %51 {
      %c0_31 = arith.constant 0 : index
      %c0_32 = arith.constant 0 : index
      %52 = vector.load %arg11[%c0_31, %c0_32] : memref<1x1xf32, #tpu.memory_space<vmem>>, vector<1x1xf32>
      %53 = vector.shape_cast %52 : vector<1x1xf32> to vector<1x1x1xf32>
      %c0_33 = arith.constant 0 : index
      %c0_34 = arith.constant 0 : index
      %c0_35 = arith.constant 0 : index
      %54 = vector.load %arg8[%c0_33, %c0_34, %c0_35] : memref<1x1x1xf32, #tpu.memory_space<vmem>>, vector<1x1x1xf32>
      tpu.vector_store %arg8[%c0_33, %c0_34, %c0_35], %53 {strides = array<i32>} : memref<1x1x1xf32, #tpu.memory_space<vmem>>, vector<1x1x1xf32>,
      %c0_36 = arith.constant 0 : index
      %c0_37 = arith.constant 0 : index
      %55 = vector.load %arg12[%c0_36, %c0_37] : memref<1x1xf32, #tpu.memory_space<vmem>>, vector<1x1xf32>
      %56 = vector.shape_cast %55 : vector<1x1xf32> to vector<1x1x1xf32>
      %c0_38 = arith.constant 0 : index
      %c0_39 = arith.constant 0 : index
      %c0_40 = arith.constant 0 : index
      %57 = vector.load %arg9[%c0_38, %c0_39, %c0_40] : memref<1x1x1xf32, #tpu.memory_space<vmem>>, vector<1x1x1xf32>
      tpu.vector_store %arg9[%c0_38, %c0_39, %c0_40], %56 {strides = array<i32>} : memref<1x1x1xf32, #tpu.memory_space<vmem>>, vector<1x1x1xf32>,
      %c0_41 = arith.constant 0 : index
      %c0_42 = arith.constant 0 : index
      %58 = vector.load %arg13[%c0_41, %c0_42] : memref<1x128xf32, #tpu.memory_space<vmem>>, vector<1x128xf32>
      %59 = vector.shape_cast %58 : vector<1x128xf32> to vector<1x1x128xf32>
      %c0_43 = arith.constant 0 : index
      %c0_44 = arith.constant 0 : index
      %c0_45 = arith.constant 0 : index
      %60 = vector.load %arg10[%c0_43, %c0_44, %c0_45] : memref<1x1x128xf32, #tpu.memory_space<vmem>>, vector<1x1x128xf32>
      tpu.vector_store %arg10[%c0_43, %c0_44, %c0_45], %59 {strides = array<i32>} : memref<1x1x128xf32, #tpu.memory_space<vmem>>, vector<1x1x128xf32>,
    } else {
    }
    return
  }
  func.func @transform_0(%arg0: i32, %arg1: i32) -> (i32, i32) {
    %c2_i32 = arith.constant 2 : i32
    %0 = arith.muli %arg0, %c2_i32 : i32
    %1 = arith.addi %0, %arg1 : i32
    %c0_i32 = arith.constant 0 : i32
    %c0_i32_0 = arith.constant 0 : i32
    return %1, %c0_i32 : i32, i32
  }
  func.func @transform_1(%arg0: i32, %arg1: i32) -> (i32, i32) {
    %c0_i32 = arith.constant 0 : i32
    %c0_i32_0 = arith.constant 0 : i32
    %c0_i32_1 = arith.constant 0 : i32
    return %c0_i32, %c0_i32_0 : i32, i32
  }
  func.func @transform_2(%arg0: i32, %arg1: i32) -> (i32, i32) {
    %c0_i32 = arith.constant 0 : i32
    %c0_i32_0 = arith.constant 0 : i32
    %c0_i32_1 = arith.constant 0 : i32
    return %c0_i32, %c0_i32_0 : i32, i32
  }
  func.func @transform_3(%arg0: i32, %arg1: i32) -> (i32, i32) {
    %c0_i32 = arith.constant 0 : i32
    %c0_i32_0 = arith.constant 0 : i32
    %c0_i32_1 = arith.constant 0 : i32
    return %c0_i32, %c0_i32_0 : i32, i32
  }
  func.func @transform_4(%arg0: i32, %arg1: i32) -> (i32, i32) {
    %c0_i32 = arith.constant 0 : i32
    %c0_i32_0 = arith.constant 0 : i32
    %c0_i32_1 = arith.constant 0 : i32
    return %c0_i32, %c0_i32_0 : i32, i32
  }
  func.func @transform_5(%arg0: i32, %arg1: i32) -> (i32, i32, i32) {
    %c2_i32 = arith.constant 2 : i32
    %0 = arith.muli %arg0, %c2_i32 : i32
    %1 = arith.addi %0, %arg1 : i32
    %c0_i32 = arith.constant 0 : i32
    %c0_i32_0 = arith.constant 0 : i32
    %c0_i32_1 = arith.constant 0 : i32
    return %1, %c0_i32, %c0_i32_0 : i32, i32, i32
  }
  func.func @transform_6(%arg0: i32, %arg1: i32) -> (i32, i32, i32) {
    %c0_i32 = arith.constant 0 : i32
    %c0_i32_0 = arith.constant 0 : i32
    %c0_i32_1 = arith.constant 0 : i32
    return %arg0, %c0_i32, %c0_i32_0 : i32, i32, i32
  }
  func.func @transform_7(%arg0: i32, %arg1: i32) -> (i32, i32, i32) {
    %c0_i32 = arith.constant 0 : i32
    %c0_i32_0 = arith.constant 0 : i32
    %c0_i32_1 = arith.constant 0 : i32
    return %arg0, %c0_i32, %c0_i32_0 : i32, i32, i32
  }
  func.func @transform_8(%arg0: i32, %arg1: i32) -> (i32, i32, i32) {
    %c0_i32 = arith.constant 0 : i32
    %c0_i32_0 = arith.constant 0 : i32
    %c0_i32_1 = arith.constant 0 : i32
    return %arg0, %c0_i32, %c0_i32_0 : i32, i32, i32
  }
}

</mosaic_0001>

<bundles_post_ra>
// kernel: tpu_custom_call.1
= control target key start
LH: loop header
LB: loop body
LE: loop exit
PB: predicated region body
PF: predicated region fallthrough
CT: control target
= control target key end

     0   :  { %s1800_s0 = inlined_call_operand.hbm [shape: f32[32,128], index: 0, kind: input, shape index: {}]   ;;  %s1801_s1 = inlined_call_operand.hbm [shape: f32[128,128], index: 1, kind: input, shape index: {}]   ;;  %s1802_s2 = inlined_call_operand.vmem [shape: f32[1,128], index: 2, kind: input, shape index: {}]   ;;  %s1803_s3 = inlined_call_operand.vmem [shape: f32[1,128], index: 3, kind: input, shape index: {}]   ;;  %s1804_s4 = inlined_call_operand.<no memory space> [shape: f32[1,1], index: 4, kind: input, shape index: {}]   ;;  %s1805_s5 = inlined_call_operand.hbm [shape: f32[4,1,8], index: 5, kind: output, shape index: {0}]   ;;  %s1806_s6 = inlined_call_operand.vmem [shape: f32[2,1,1], index: 6, kind: output, shape index: {1}]   ;;  %s1807_s7 = inlined_call_operand.vmem [shape: f32[2,1,1], index: 7, kind: output, shape index: {2}]   ;;  %s1808_s8 = inlined_call_operand.hbm [shape: f32[2,1,128], index: 8, kind: output, shape index: {3}]  }
   0x1   :  { %1828 = sst [smem:[#allocation26_spill]] %s1800_s0  ;;  %v14_v0 = vstv %s1804_s4 }
   0x2   :  { %1829 = sst [smem:[#allocation27_spill]] %s1801_s1  ;;  %15 = vst [vmem:[#allocation5] sm:$0x1] %v14_v0 }
   0x3   :  { %1830 = sst [smem:[#allocation28_spill]] %s1802_s2 }
   0x4   :  { %1831 = sst [smem:[#allocation29_spill]] %s1803_s3 }
   0x5   :  { %1832 = sst [smem:[#allocation30_spill]] %s1805_s5 }
   0x6   :  { %1833 = sst [smem:[#allocation31_spill]] %s1806_s6 }
   0x7   :  { %1834 = sst [smem:[#allocation32_spill]] %s1808_s8 }
   0x8   :  { %16 = vsyncpa [#allocation7], 0 }
   0x9   :  { %18 = vsyncpa [#allocation7 + $0x1], 0 }
   0xa   :  { %19 = vsyncpa [#allocation10], 0 }
   0xb   :  { %20 = vsyncpa [#allocation8], 0 }
   0xc   :  { %22 = vsyncpa [#allocation8 + $0x1], 0 }
   0xd   :  { %23 = vsyncpa [#allocation13], 0 }
   0xe   :  { %25 = vsyncpa [#allocation13 + $0x1], 0  ;;  %s1439_s29 = smov 0   ;;  %s1441_s30 = smov 0  }
   0xf   :  { %s1443_s9 = smov 0   ;;  %s1445_s10 = smov 0  }
  0x10   :  { %s1447_s11 = smov 0   ;;  %s1449_s12 = smov 0  }
  0x11   :  { %s1451_s4 = smov 0   ;;  %s1453_s13 = smov 0  }
  0x12   :  { %s1455_s14 = smov 0   ;;  %s1457_s15 = smov 0  }
  0x13   :  { %s1459_s16 = smov 0  }
  0x14 LB: > { %1835 = sst [smem:[#allocation18_spill]] %s1337_s29  ;;  %s911_s17 = sadd.s32 4294967295, %s1377_s16   ;;  %s1377_s16 = sphi %s1459_s16, %s31_s16   ;;  %s1373_s15 = sphi %s1457_s15, %s1888_s15   ;;  %s1369_s14 = sphi %s1455_s14, %s1887_s14   ;;  %s1365_s13 = sphi %s1453_s13, %s1886_s13   ;;  %s1361_s4 = sphi %s1451_s4, %s1879_s4   ;;  %s1357_s12 = sphi %s1449_s12, %s1885_s12   ;;  %s1353_s11 = sphi %s1447_s11, %s1884_s11   ;;  %s1349_s10 = sphi %s1445_s10, %s1883_s10   ;;  %s1345_s9 = sphi %s1443_s9, %s1882_s9   ;;  %s1341_s30 = sphi %s1441_s30, %s1881_s30   ;;  %s1337_s29 = sphi %s1439_s29, %s1880_s29  }
  0x15   : > { %1836 = sst [smem:[#allocation19_spill]] %s1349_s10  ;;  %s912_s18 = sadd.s32 4294967294, %s1377_s16  }
  0x16   : > { %1837 = sst [smem:[#allocation20_spill]] %s1361_s4  ;;  %p67_p0 = scmp.ne.s32.totalorder %s1353_s11, %s1349_s10 }
  0x17   : > { %1838 = sst [smem:[#allocation21_spill]] %s1369_s14  ;;  %p1498_p1 = scmp.eq.s32.totalorder %s911_s17, 0 }
  0x18   : > { %p1502_p2 = scmp.eq.s32.totalorder %s911_s17, 3  ;;  %p185_p3 = scmp.eq.s32.totalorder %s912_s18, 3 }
  0x19   : > { %s1839_s19 = scalar_select %p1498_p1, 1, 0 }
  0x1a   : > { %s1840_s20 = scalar_select %p1502_p2, 1, 0 }
  0x1b   : > { %p1508_p4 = por %p1498_p1, %p67_p0  ;;  %p256_p5 = scmp.ne.s32.totalorder %s1345_s9, %s1341_s30 }
  0x1c   : > { %p1514_p6 = por %p185_p3, %p67_p0  ;;  %p262_p7 = scmp.ne.s32.totalorder %s1341_s30, %s1337_s29 }
  0x1d   : > { %s1841_s21 = scalar_select %p1508_p4, 1, 0 }
  0x1e   : > { %s1842_s22 = scalar_select %p1514_p6, 1, 0 }
  0x1f   : > { %p1522_p8 = por %p256_p5, %p1502_p2  ;;  %p917_p9 = scmp.ge.s32.totalorder %s1377_s16, 1 }
  0x20   : > { %1843 = sst [smem:[#allocation22_spill]] %s1842_s22  ;;  %p1527_p10 = por %p262_p7, %p185_p3 }
  0x21   : > { %s1844_s23 = scalar_select %p1522_p8, 1, 0 }
  0x22   : > { %s1846_s24 = scalar_select %p1527_p10, 1, 0 }
  0x23   : > { %1845 = sst [smem:[#allocation23_spill]] %s1844_s23  ;;  %p270_p11 = scmp.lt.s32.totalorder %s1377_s16, 5 }
  0x24   : > { %1847 = sst [smem:[#allocation24_spill]] %s1846_s24  ;;  %s1379_s26 = smov [#allocation9]  }
  0x25   : > { %p1532_p12 = pnand %p917_p9, %p270_p11  ;;  %s282_s27 = sshll.u32 %s1379_s26, 4  ;;  %s283_s27 = int_to_ptr.vmem [resolvable:$true] %s282_s27 }
  0x26   : > { %s1850_s1 = sld [smem:[#allocation27_spill]] }
  0x27   : > { %s1848_s25 = scalar_select %p1532_p12, 1, 0 }
  0x28   : > { %p1037_p13 = pneg %p1532_p12 }
  0x2a   : > { %p1540_p0 = pnand %p1037_p13, %p1498_p1 }
  0x2c   : > { %s1161_s24 = scalar_lea.hbm %s1850_s1, 2048  ;;  %p1163_p5 = pneg %p1540_p0 }
  0x2d   : > { %p1162_p3 = scmp.ne.s32.totalorder %s1850_s1, %s1161_s24  ;;  %p1168_p11 = scmp.lt.u32.totalorder %s1161_s24, %s1850_s1 }
  0x2f   : > { %p1164_p7 = pnand %p1163_p5, %p1162_p3 }
  0x31   : > { %p1165_p9 = pneg %p1164_p7 }
  0x33   : > { %p1170_p13 = pnand %p1168_p11, %p1165_p9 }
  0x35   : > { %1173 = shalt.err (!%p1170_p13)
}
  0x36   : > { %s1174_s8 = scalar_lea.vmem %s283_s27, 2048  ;;  %p1182_p1 = scmp.lt.s32.totalorder %s283_s27, %s283_s27 }
  0x37   : > { %p1175_p10 = scmp.ne.s32.totalorder %s283_s27, %s1174_s8  ;;  %p1183_p4 = scmp.lt.s32.totalorder %s1174_s8, %s1174_s8 }
  0x39   : > { %p1177_p6 = pnand %p1175_p10, %p1163_p5  ;;  %p1184_p12 = por %p1183_p4, %p1182_p1 }
  0x3b   : > { %p1178_p8 = pneg %p1177_p6 }
  0x3d   : > { %p1185_p2 = pnand %p1184_p12, %p1178_p8 }
  0x3f   : > { %1188 = shalt.err (!%p1185_p2)
}
  0x40   : > { %s1380_s29 = smov 128   ;;  %s1381_s10 = smov 8  }
  0x41   : > { %1040 = dma.hbm_to_vmem [thread:$0]  (!%p1540_p0), %s1850_s1, 2048, %s283_s27, [#allocation10], %s1380_s29, %s1380_s29, %s1381_s10  }
  0x42   : > { %s40_s24 = sadd.s32 1, %s1369_s14  ;;  %s43_s17 = sadd.s32 1, %s1373_s15 }
  0x43   : > { %p41_p1 = scmp.ge.s32.totalorder %s40_s24, 2  ;;  %s913_s18 = sshll.u32 %s1373_s15, 1 }
  0x44   : > { %s54_s26 = sadd.s32 1, %s1357_s12  ;;  %s48_s23 = sadd.s32 %s1369_s14, %s913_s18 }
  0x45   : > { %s1890_s24 = smov (%p41_p1, %s40_s24), 0  ;;  %s1892_s17 = smov (!%p41_p1, %s43_s17), %s1373_s15 }
  0x46   : > { %p61_p2 = scmp.ne.s32.totalorder %s1357_s12, %s1353_s11  ;;  %p45_p4 = scmp.ge.s32.totalorder %s1892_s17, 2 }
  0x47   : > { %p62_p6 = scmp.eq.s32.totalorder %s1377_s16, 0  ;;  %p1851_p8 = scmp.ne.s32.totalorder %s1840_s20, 0 }
  0x48   : > { %s246_s28 = sadd.s32 1, %s1345_s9  ;;  %s1894_s17 = smov (%p45_p4, %s1892_s17), 0 }
  0x49   : > { %p1573_p10 = por %p1851_p8, %p61_p2  ;;  %p1580_p12 = por %p62_p6, %p61_p2 }
  0x4a   : > { %p1053_p0 = scmp.lt.s32.totalorder %s1377_s16, 4  ;;  %s914_s10 = sshll.u32 %s1894_s17, 1 }
  0x4b   : > { %s1852_s27 = scalar_select %p1573_p10, 1, 0 }
  0x4c   : > { %s243_s22 = ssub.s32 %s1373_s15, %s1894_s17  ;;  %s50_s8 = sadd.s32 %s914_s10, %s1890_s24 }
  0x4d   : > { %1853 = sst [smem:[#allocation25_spill]] %s1852_s27  ;;  %p244_p3 = scmp.eq.s32.totalorder %s243_s22, 0 }
  0x4e   : > { %s51_s20 = ssub.s32 %s48_s23, %s50_s8  ;;  %s305_s18 = sand.u32 1, %s1357_s12  }
  0x4f   : > { %p52_p5 = scmp.eq.s32.totalorder %s51_s20, 0  ;;  %s920_s5 = sshll.u32 %s305_s18, 3 }
  0x50   : > { %s1591_s1 = scalar_select %p244_p3, %s1345_s9, %s246_s28  }
  0x51   : > { %s1594_s14 = scalar_select %p52_p5, %s1357_s12, %s54_s26  }
  0x52   : > { %s922_s27 = sshll.u32 %s48_s23, 7  ;;  %s1855_s0 = sld [smem:[#allocation26_spill]] }
  0x53   : > { %s309_s10 = scalar_lea.vmem [#allocation6], %s920_s5  ;;  %p1605_p7 = pnand %p1053_p0, %p1580_p12 }
  0x54   : > { %s318_s22 = sshll.u32 %s309_s10, 4  ;;  %s306_s23 = scalar_lea.sflag [#allocation7], %s305_s18  ;;  %s1609_s22 = int_to_ptr.vmem [resolvable:$true] %s318_s22 }
  0x55   : > { %p1191_p11 = pneg %p1605_p7 }
  0x58   : > { %s1599_s4 = scalar_lea.hbm %s1855_s0, %s922_s27  ;;  %s1194_s26 = scalar_lea.hbm %s1855_s0, 512 }
  0x59   : > { %s1189_s2 = scalar_lea.hbm %s1599_s4, 128  ;;  %p1195_p2 = scmp.lt.u32.totalorder %s1599_s4, %s1855_s0 }
  0x5a   : > { %p1190_p9 = scmp.ne.s32.totalorder %s1599_s4, %s1189_s2  ;;  %p1196_p4 = scmp.lt.u32.totalorder %s1194_s26, %s1189_s2 }
  0x5b   : > { %p1198_p8 = scmp.lt.u32.totalorder %s1189_s2, %s1599_s4 }
  0x5c   : > { %p1192_p13 = pnand %p1191_p11, %p1190_p9  ;;  %p1197_p6 = por %p1196_p4, %p1195_p2 }
  0x5e   : > { %p1193_p1 = pneg %p1192_p13  ;;  %p1199_p12 = por %p1198_p8, %p1197_p6 }
  0x60   : > { %p1200_p0 = pnand %p1199_p12, %p1193_p1 }
  0x62   : > { %1203 = shalt.err (!%p1200_p0)
}
  0x63   : > { %s1204_s8 = scalar_lea.vmem %s1609_s22, 128  ;;  %s1382_s20 = smov [#allocation6]  }
  0x64   : > { %p1205_p3 = scmp.ne.s32.totalorder %s1609_s22, %s1204_s8  ;;  %s1209_s18 = sshll.u32 %s1382_s20, 4  ;;  %s1210_s18 = int_to_ptr.vmem [resolvable:$false] %s1209_s18 }
  0x65   : > { %s1211_s10 = scalar_lea.vmem %s1210_s18, 256  ;;  %p1212_p13 = scmp.lt.s32.totalorder %s1609_s22, %s1210_s18 }
  0x66   : > { %p1207_p5 = pnand %p1205_p3, %p1191_p11  ;;  %p1213_p2 = scmp.lt.s32.totalorder %s1211_s10, %s1204_s8 }
  0x68   : > { %p1208_p9 = pneg %p1207_p5  ;;  %p1214_p4 = por %p1213_p2, %p1212_p13 }
  0x6a   : > { %p1215_p6 = pnand %p1214_p4, %p1208_p9 }
  0x6c   : > { %1218 = shalt.err (!%p1215_p6)
}
  0x6d   : > { %1044 = dma.hbm_to_vmem [thread:$0]  (!%p1605_p7), %s1599_s4, 128, %s1609_s22, %s306_s23  }
  0x6e   : > { %p1857_p1 = scmp.ne.s32.totalorder %s1848_s25, 0 }
  0x6f   : > { %s1639_s2 = sand.u32 (!%p1857_p1), 1, %s1353_s11   ;;  %p1858_p11 = scmp.ne.s32.totalorder (!%p1857_p1), %s1841_s21, 0 }
  0x70   : > { %327 = sbr.rel (%p1857_p1) target bundleno = 1182 (0x49e), region = 40  ;;  %s924_s3 = sshll.u32 (!%p1857_p1), %s1639_s2, 3 }
  0x71   : > { %s330_s5 = scalar_lea.sflag (!%p1857_p1), [#allocation7], %s1639_s2  ;;  %s1643_s26 = scalar_lea.vmem (!%p1857_p1), [#allocation6], %s924_s3 }
  0x77   : > { %1320 = dma.done.wait (%p1858_p11), %s330_s5, 128  }
  0x78   : > { %1322 = vsyncadd (%p1858_p11), %s330_s5, 4294967168  ;;  %p1859_p7 = scmp.ne.s32.totalorder %s1839_s19, 0 }
  0x7a   : > { %1324 = dma.done.wait (%p1859_p7), [#allocation10], 2048  }
  0x7b   : > { %1326 = vsyncadd (%p1859_p7), [#allocation10], 4294965248  ;;  %s1827_s4 = sand.u32 1, %s1341_s30   ;;  %p383_p8 = scmp.lt.s32.totalorder %s1365_s13, 1 }
  0x7c   : > { %s1860_s6 = sld [smem:[#allocation31_spill]]  ;;  %s362_s29 = scalar_lea.vmem [#allocation11], %s1639_s2 }
  0x7d   : > { %s1656_s25 = scalar_select %p383_p8, %s1365_s13, 1 }
  0x7e   : > { %s1669_s8 = scalar_lea.vmem [#allocation12], %s1827_s4  ;;  %s1861_s20 = sld [smem:[#allocation20_spill]] }
  0x7f   : > { %s388_s19 = scalar_lea.vmem %s1807_s7, %s1656_s25 }
  0x82   : > { %s385_s21 = scalar_lea.vmem %s1860_s6, %s1656_s25 }
  0x84   : > { %p926_p12 = scmp.ne.s32.totalorder %s1861_s20, 0 }
  0x85   : > { %vm393_vm0 = vcmask (!%p926_p12), 0   ;;  %v1383_v1 = vmov (!%p926_p12), -1e+30   ;;  %v1384_v2 = vmov (!%p926_p12), 0.0  }
  0x86   : > { %392 = sbr.rel (%p926_p12) target bundleno = 141 (0x8d), region = 52  ;;  %394 = vst.msk [vmem:[#allocation2] sm:$0x1] (!%p926_p12), %vm393_vm0, %v1383_v1  ;;  %395 = vst.msk [vmem:[#allocation3] sm:$0x1] (!%p926_p12), %vm393_vm0, %v1384_v2 }
  0x87   : > { %396 = vst [vmem:[#allocation4] sm:$0x1] (!%p926_p12), %v1384_v2 }
  0x8d PF: > { %v398_v3 = vld [vmem:[#allocation9] sm:$0xff]  ;;  %v399_v4 = vld [vmem:[#allocation9 + $0x8] sm:$0xff]  ;;  %v400_v5 = vld [vmem:[#allocation9 + $0x10] sm:$0xff]  ;;  %v1385_v6 = vmov 0.0|0.0   ;;  %vm1386_vm1 = vmmov 0   ;;  %v1387_v9 = vmov 0.0   ;;  %v499_v38 = vlaneseq }
  0x8e   : > { %1003 = vmatprep.subr.bf16.mxu0 %v1385_v6  ;;  %v1004_v7 = vpack.c.bf16 %v399_v4, %v398_v3  ;;  %v401_v8 = vld [vmem:[#allocation9 + $0x18] sm:$0xff]  ;;  %990 = vmatprep.mubr.msk.f32.mxu0 %vm1386_vm1, %v1387_v9  ;;  %v402_v11 = vld [vmem:[#allocation9 + $0x20] sm:$0xff]  ;;  %v403_v12 = vld [vmem:[#allocation9 + $0x28] sm:$0xff]  ;;  %v1388_v31 = vmov 0   ;;  %s1862_s18 = sld [smem:[#allocation20_spill]]  ;;  %s1864_s28 = sld [smem:[#allocation29_spill]] }
  0x8f   : > { %993 = vmatprep.subr.mxu1 %v1387_v9  ;;  %995 = vmatprep.mubr.msk.f32.mxu1 %vm1386_vm1, %v1387_v9  ;;  %v1007_v10 = vpack.c.bf16 %v401_v8, %v400_v5  ;;  %v1010_v13 = vpack.c.bf16 %v403_v12, %v402_v11  ;;  %v404_v14 = vld [vmem:[#allocation9 + $0x30] sm:$0xff]  ;;  %v405_v15 = vld [vmem:[#allocation9 + $0x38] sm:$0xff]  ;;  %v406_v17 = vld [vmem:[#allocation9 + $0x40] sm:$0xff]  ;;  %s1863_s5 = sld [smem:[#allocation28_spill]]  ;;  %s928_s23 = sshll.u32 %s1365_s13, 1  ;;  %v500_v39 = vshrl.u32 %v499_v38, 7 }
  0x90   : > { %1005 = vmatpush3.bf16.msra.mxu0 %v1004_v7  ;;  %v1013_v16 = vpack.c.bf16 %v405_v15, %v404_v14  ;;  %v407_v18 = vld [vmem:[#allocation9 + $0x48] sm:$0xff]  ;;  %v408_v20 = vld [vmem:[#allocation9 + $0x50] sm:$0xff]  ;;  %v409_v21 = vld [vmem:[#allocation9 + $0x58] sm:$0xff]  ;;  %1153 = vset.pattern.permute.xlu0 %v1388_v31  ;;  %v577_v40 = vand.u32 127, %v499_v38  ;;  %vm582_vm3 = vcmask 57344   ;;  %vm610_vm4 = vcmask 0  }
  0x91   : > { %1006 = vmatprep.subr.bf16.mxu0 %v1385_v6  ;;  %v1016_v19 = vpack.c.bf16 %v407_v18, %v406_v17  ;;  %v1019_v22 = vpack.c.bf16 %v409_v21, %v408_v20  ;;  %v410_v23 = vld [vmem:[#allocation9 + $0x60] sm:$0xff]  ;;  %v411_v24 = vld [vmem:[#allocation9 + $0x68] sm:$0xff]  ;;  %v412_v26 = vld [vmem:[#allocation9 + $0x70] sm:$0xff]  ;;  %1154 = vset.pattern.permute.xlu1 %v1388_v31  ;;  %v501_v41 = vsub.s32 0, %v500_v39  ;;  %vm623_vm5 = vcmask 64512  }
  0x92   : > { %v1022_v25 = vpack.c.bf16 %v411_v24, %v410_v23  ;;  %v413_v27 = vld [vmem:[#allocation9 + $0x78] sm:$0xff]  ;;  %v493_v30 = vld [vmem:[#allocation5] sm:$0x1]  ;;  %v584_v51 = vld [vmem:[#allocation2] sm:$0x1] }
  0x93   : > { %v1025_v28 = vpack.c.bf16 %v413_v27, %v412_v26  ;;  %v397_v29 = vld [vmem:[%s1643_s26] sm:$0xff]  ;;  %496 = vperm.xlu0 %1153, %v493_v30   ;;  %v604_v63 = vld [vmem:[#allocation3] sm:$0x1]  ;;  %v612_v5 = vld [vmem:[#allocation4] sm:$0x1] }
  0x94   : > { %1008 = vmatpush3.bf16.msra.mxu0 %v1007_v10  ;;  %v492_v37 = vld [vmem:[%s1864_s28] sm:$0x1]  ;;  %s1684_s27 = sadd.s32 %s1862_s18, %s928_s23  ;;  %p931_p0 = scmp.ne.s32.totalorder %s1862_s18, 1 }
  0x95   : > { %1009 = vmatprep.subr.bf16.mxu0 %v1385_v6  ;;  %v927_v32 = vld [vmem:[%s1863_s5] ss:$0 sm:$0xff]  ;;  %s929_s20 = sshll.u32 %s1684_s27, 3 }
  0x96   : > { %v578_v42 = vstv %s929_s20 }
  0x97   : > { %v579_v44 = vadd.s32 %v578_v42, %v577_v40 }
  0x98   : > { %1011 = vmatpush3.bf16.msra.mxu0 %v1010_v13 }
  0x99   : > { %1012 = vmatprep.subr.bf16.mxu0 %v1385_v6  ;;  %vm580_vm2 = vcmp.lt.s32.totalorder %v579_v44, 20 }
  0x9c   : > { %1014 = vmatpush3.bf16.msra.mxu0 %v1013_v16 }
  0x9d   : > { %1015 = vmatprep.subr.bf16.mxu0 %v1385_v6 }
  0xa0   : > { %1017 = vmatpush3.bf16.msra.mxu0 %v1016_v19 }
  0xa1   : > { %1018 = vmatprep.subr.bf16.mxu0 %v1385_v6 }
  0xa4   : > { %1020 = vmatpush3.bf16.msra.mxu0 %v1019_v22 }
  0xa5   : > { %1021 = vmatprep.subr.bf16.mxu0 %v1385_v6 }
  0xa8   : > { %1023 = vmatpush3.bf16.msra.mxu0 %v1022_v25 }
  0xa9   : > { %1024 = vmatprep.subr.bf16.mxu0 %v1385_v6 }
  0xac   : > { %1026 = vmatpush3.bf16.msra.mxu0 %v1025_v28 }
  0xaf   : > { %991 = vmatmul.mubr.f32.vlgmr.msra.gmra.mrb[0].mxu0 %v397_v29 }
 0x112   : > { %v497_v43 = vpop.permute.xlu0 %496 }
 0x113   : > { %v502_v45 = vrot.slane %v497_v43, %v501_v41 }
 0x182   : > { %v487_v33 = vpop.f32.mrb[0].mxu0 }
 0x183   : > { %v488_v34 = vadd.f32 %v927_v32, %v487_v33  ;;  %v992_v35 = vpop.f32.mrb[1].mxu0 }
 0x185   : > { %1155 = vtanh.f32 %v488_v34 }
 0x18f   : > { %v1156_v36 = vpop.eup %1155 }
 0x190   : > { %994 = vmatpush3.xpose.msra.mxu1 %v1156_v36 }
 0x191   : > { %998 = vmatprep.subr.mxu1 %v1387_v9 }
 0x193   : > { %996 = vmatmul.mubr.f32.vlgmr.msra.gmra.mrb[0].mxu1 %v492_v37 }
 0x194   : > { %999 = vmatpush3.msra.mxu1 %v397_v29  ;;  %1000 = vmatprep.mubr.msk.f32.mxu1 %vm1386_vm1, %v1387_v9 }
 0x266   : > { %v569_v46 = vpop.f32.mrb[0].mxu1 }
 0x267   : > { %v570_v47 = vadd.f32 %v569_v46, %v502_v45  ;;  %v997_v48 = vpop.f32.mrb[1].mxu1 }
 0x269   : > { %v581_v49 = vsel %vm580_vm2, %v570_v47, -1e+30 }
 0x26a   : > { %v585_v50 = vsel %vm582_vm3, %v581_v49, -inf  ;;  %583 = vst.msk [vmem:[%s362_s29] sm:$0x1] %vm582_vm3, %v581_v49 }
 0x26b   : > { %586 = vmax.xlane.f32.xlu0 %v585_v50 }
 0x2f8   : > { %v587_v52 = vpop.xlane.xlu0 %586 }
 0x2f9   : > { %v588_v53 = vmax.f32 %v584_v51, %v587_v52 }
 0x2fb   : > { %v589_v54 = vsub.f32 %v584_v51, %v588_v53  ;;  %699 = vst.msk [vmem:[#allocation2] sm:$0x1] %vm610_vm4, %v588_v53  ;;  %594 = vperm.xlu1 %1154, %v588_v53  }
 0x2fd   : > { %v590_v55 = vmul.f32 1.442695, %v589_v54 }
 0x2ff   : > { %1157 = vpow2.f32 %v590_v55 }
 0x302   : > { %v704_v10 = vld [vmem:[#allocation2] sm:$0x1] (!%p931_p0) }
 0x303   : > { %705 = vst.msk [vmem:[%s385_s21] sm:$0x1] (!%p931_p0), %vm610_vm4, %v704_v10 }
 0x309   : > { %v1158_v56 = vpop.eup %1157 }
 0x30a   : > { %615 = vperm.xlu0 %1153, %v1158_v56   ;;  %v605_v0 = vmul.f32 %v1158_v56, %v604_v63 }
 0x37a   : > { %v595_v57 = vpop.permute.xlu1 %594 }
 0x37b   : > { %v600_v58 = vrot.slane %v595_v57, %v501_v41 }
 0x37d   : > { %v601_v59 = vsub.f32 %v581_v49, %v600_v58 }
 0x37f   : > { %v602_v60 = vmul.f32 1.442695, %v601_v59 }
 0x381   : > { %1159 = vpow2.f32 %v602_v60 }
 0x389   : > { %v616_v3 = vpop.permute.xlu0 %615 }
 0x38a   : > { %v621_v4 = vrot.slane %v616_v3, %v501_v41 }
 0x38b   : > { %v1160_v61 = vpop.eup %1159 }
 0x38c   : > { %1001 = vmatmul.mubr.msk.f32.vlgmr.msra.gmra.mrb[2].mxu1 %vm623_vm5, %v1160_v61  ;;  %v606_v62 = vsel %vm582_vm3, %v1160_v61, 0.0  ;;  %v622_v6 = vmul.f32 %v621_v4, %v612_v5 }
 0x38d   : > { %607 = vadd.xlane.f32.xlu1 %v606_v62 }
 0x41a   : > { %v608_v1 = vpop.xlane.xlu1 %607 }
 0x41b   : > { %v609_v2 = vadd.f32 %v608_v1, %v605_v0 }
 0x41d   : > { %611 = vst.msk [vmem:[#allocation3] sm:$0x1] %vm610_vm4, %v609_v2 }
 0x424   : > { %v706_v11 = vld [vmem:[#allocation3] sm:$0x1] (!%p931_p0) }
 0x425   : > { %707 = vst.msk [vmem:[%s388_s19] sm:$0x1] (!%p931_p0), %vm610_vm4, %v706_v11 }
 0x45c   : > { %703 = sbr.rel (%p931_p0) target bundleno = 1131 (0x46b), region = 56 }
 0x45f   : > { %v693_v7 = vpop.f32.mrb[2].mxu1 }
 0x460   : > { %v697_v8 = vadd.f32 %v693_v7, %v622_v6  ;;  %v1002_v9 = vpop.f32.mrb[3].mxu1 }
 0x462   : > { %698 = vst [vmem:[#allocation4] sm:$0x1] %v697_v8 }
 0x469   : > { %v708_v12 = vld [vmem:[#allocation4] sm:$0x1] }
 0x46a   : > { %709 = vst [vmem:[%s1669_s8] sm:$0x1] %v708_v12 }
 0x46b PF: > { %s933_s26 = sshll.u32 %s1684_s27, 4  ;;  %s1867_s20 = sld [smem:[#allocation30_spill]] }
 0x46c   : > { %s735_s21 = sshll.u32 %s362_s29, 4  ;;  %s711_s10 = scalar_lea.sflag [#allocation8], %s1639_s2  ;;  %s736_s21 = int_to_ptr.vmem [resolvable:$true] %s735_s21 }
 0x46d   : > { %s1219_s3 = scalar_lea.vmem %s736_s21, 16  ;;  %s1389_s25 = smov [#allocation11]  }
 0x46e   : > { %p1220_p3 = scmp.ne.s32.totalorder %s736_s21, %s1219_s3  ;;  %s1223_s19 = sshll.u32 %s1389_s25, 4  ;;  %s1224_s19 = int_to_ptr.vmem [resolvable:$false] %s1223_s19 }
 0x46f   : > { %s1225_s5 = scalar_lea.vmem %s1224_s19, 32  ;;  %p1226_p13 = scmp.lt.s32.totalorder %s736_s21, %s1224_s19 }
 0x470   : > { %p1221_p5 = pnand %p1220_p3, %p1573_p10  ;;  %p1227_p2 = scmp.lt.s32.totalorder %s1225_s5, %s1219_s3 }
 0x471   : > { %s1712_s4 = scalar_lea.hbm %s1867_s20, %s933_s26 }
 0x472   : > { %p1222_p9 = pneg %p1221_p5  ;;  %p1228_p4 = por %p1227_p2, %p1226_p13 }
 0x474   : > { %p1229_p6 = pnand %p1228_p4, %p1222_p9 }
 0x476   : > { %1232 = shalt.err (!%p1229_p6)
}
 0x477   : > { %s1233_s2 = scalar_lea.hbm %s1712_s4, 16  ;;  %s1237_s22 = scalar_lea.hbm %s1867_s20, 64 }
 0x478   : > { %p1234_p1 = scmp.ne.s32.totalorder %s1712_s4, %s1233_s2  ;;  %p1238_p8 = scmp.lt.u32.totalorder %s1712_s4, %s1867_s20 }
 0x479   : > { %p1239_p12 = scmp.lt.u32.totalorder %s1237_s22, %s1233_s2  ;;  %p1241_p3 = scmp.lt.u32.totalorder %s1233_s2, %s1712_s4 }
 0x47a   : > { %p1235_p11 = pnand %p1234_p1, %p1573_p10 }
 0x47b   : > { %p1240_p0 = por %p1239_p12, %p1238_p8 }
 0x47c   : > { %p1236_p7 = pneg %p1235_p11 }
 0x47d   : > { %p1242_p5 = por %p1241_p3, %p1240_p0 }
 0x47f   : > { %p1243_p9 = pnand %p1242_p5, %p1236_p7 }
 0x481   : > { %1246 = shalt.err (!%p1243_p9)
}
 0x482   : > { %s1868_s23 = sld [smem:[#allocation23_spill]]  ;;  %s934_s3 = sshll.u32 %s1365_s13, 4 }
 0x483   : > { %1033 = dma.vmem_to_hbm [thread:$0]  (%p1573_p10), %s736_s21, 16, %s1712_s4, %s711_s10  }
 0x484   : > { %s754_s25 = sshll.u32 %s1669_s8, 4  ;;  %s1869_s29 = sld [smem:[#allocation32_spill]]  ;;  %s755_s25 = int_to_ptr.vmem [resolvable:$true] %s754_s25 }
 0x485   : > { %s1871_s2 = sand.u32 1, %s1341_s30   ;;  %s1247_s28 = scalar_lea.vmem %s755_s25, 16 }
 0x486   : > { %s721_s22 = scalar_lea.sflag [#allocation13], %s1871_s2  ;;  %p1248_p13 = scmp.ne.s32.totalorder %s755_s25, %s1247_s28 }
 0x487   : > { %s1390_s18 = smov [#allocation12]  }
 0x488   : > { %p1872_p2 = scmp.ne.s32.totalorder %s1868_s23, 0  ;;  %s1251_s0 = sshll.u32 %s1390_s18, 4  ;;  %s1252_s0 = int_to_ptr.vmem [resolvable:$false] %s1251_s0 }
 0x489   : > { %s1253_s6 = scalar_lea.vmem %s1252_s0, 32  ;;  %p1254_p10 = scmp.lt.s32.totalorder %s755_s25, %s1252_s0 }
 0x48a   : > { %s1870_s27 = smov %s1869_s29  ;;  %s1739_s26 = scalar_lea.hbm %s1869_s29, %s934_s3 }
 0x48b   : > { %p1249_p4 = pnand %p1248_p13, %p1872_p2  ;;  %p1255_p1 = scmp.lt.s32.totalorder %s1253_s6, %s1247_s28 }
 0x48d   : > { %p1250_p6 = pneg %p1249_p4  ;;  %p1256_p11 = por %p1255_p1, %p1254_p10 }
 0x48f   : > { %p1257_p7 = pnand %p1256_p11, %p1250_p6 }
 0x491   : > { %1260 = shalt.err (!%p1257_p7)
}
 0x492   : > { %s1261_s13 = scalar_lea.hbm %s1739_s26, 16  ;;  %s1265_s21 = scalar_lea.hbm %s1870_s27, 32 }
 0x493   : > { %p1262_p8 = scmp.ne.s32.totalorder %s1739_s26, %s1261_s13  ;;  %p1266_p3 = scmp.lt.u32.totalorder %s1739_s26, %s1870_s27 }
 0x494   : > { %p1267_p5 = scmp.lt.u32.totalorder %s1265_s21, %s1261_s13  ;;  %p1269_p13 = scmp.lt.u32.totalorder %s1261_s13, %s1739_s26 }
 0x495   : > { %p1263_p12 = pnand %p1262_p8, %p1872_p2 }
 0x496   : > { %p1268_p9 = por %p1267_p5, %p1266_p3 }
 0x497   : > { %p1264_p0 = pneg %p1263_p12 }
 0x498   : > { %p1270_p4 = por %p1269_p13, %p1268_p9 }
 0x49a   : > { %p1271_p6 = pnand %p1270_p4, %p1264_p0 }
 0x49c   : > { %1274 = shalt.err (!%p1271_p6)
}
 0x49d   : > { %1034 = dma.vmem_to_hbm [thread:$0]  (%p1872_p2), %s755_s25, 16, %s1739_s26, %s721_s22  }
 0x49e PF: > { %s1873_s6 = sld [smem:[#allocation19_spill]]  ;;  %s1874_s3 = sld [smem:[#allocation22_spill]] }
 0x49f   : > { %p1055_p10 = scmp.ge.s32.totalorder %s1377_s16, 2 }
 0x4a4   : > { %s766_s19 = sand.u32 1, %s1873_s6   ;;  %p1875_p1 = scmp.ne.s32.totalorder %s1874_s3, 0 }
 0x4a5   : > { %s767_s5 = scalar_lea.sflag [#allocation8], %s766_s19 }
 0x4a6   : > { %p1046_p11 = pnand %p1055_p10, %p1875_p1 }
 0x4a8   : > { %1328 = dma.done.wait (!%p1046_p11), %s767_s5, 16  }
 0x4a9   : > { %1330 = vsyncadd (!%p1046_p11), %s767_s5, 4294967280  ;;  %s1876_s29 = sld [smem:[#allocation18_spill]]  ;;  %s1877_s2 = sld [smem:[#allocation24_spill]] }
 0x4af   : > { %s786_s28 = sand.u32 1, %s1876_s29   ;;  %p1878_p7 = scmp.ne.s32.totalorder %s1877_s2, 0 }
 0x4b0   : > { %s787_s18 = scalar_lea.sflag [#allocation13], %s786_s28 }
 0x4b1   : > { %p1049_p8 = pnand %p1055_p10, %p1878_p7 }
 0x4b3   : > { %1332 = dma.done.wait (!%p1049_p8), %s787_s18, 16  }
 0x4b4   : > { %1334 = vsyncadd (!%p1049_p8), %s787_s18, 4294967280  ;;  %s31_s16 = sadd.s32 1, %s1377_s16   ;;  %s1879_s4 = sld [smem:[#allocation21_spill]] }
 0x4b5   : > { %p28_p2 = scmp.ge.s32.totalorder %s31_s16, 6   ;;  %s1880_s29 = smov %s1341_s30 }
 0x4b6   : > { %s1881_s30 = smov %s1345_s9  ;;  %s1882_s9 = smov %s1591_s1 }
 0x4b7   : > { %s1883_s10 = smov %s1353_s11  ;;  %s1884_s11 = smov %s1357_s12 }
 0x4b8   : > { %s1885_s12 = smov %s1594_s14  ;;  %s1886_s13 = smov %s1373_s15 }
 0x4b9   : > { %s1887_s14 = smov %s1890_s24  ;;  %s1888_s15 = smov %s1894_s17 }
 0x4ba   :  { %30 = sbr.rel (!%p28_p2) target bundleno = 20 (0x14), region = 138 }
 0x4c1   :  { %791 = vsyncpa [#allocation7], 1 }
 0x4c2   :  { %793 = vsyncpa [#allocation7 + $0x1], 1 }
 0x4c3   :  { %794 = vsyncpa [#allocation10], 1 }
 0x4c4   :  { %795 = vsyncpa [#allocation8], 1 }
 0x4c5   :  { %797 = vsyncpa [#allocation8 + $0x1], 1 }
 0x4c6   :  { %798 = vsyncpa [#allocation13], 1 }
 0x4c7   :  { %800 = vsyncpa [#allocation13 + $0x1], 1 }

</bundles_post_ra>
